<compile_context>
chip_gen: v7x
topology: tpu7x:2x2x1
jax: 0.10.0
libtpu: 0.0.40
codegen_flags: <defaults>
</compile_context>

<pallas_src>
import math

import jax
import jax.numpy as jnp
from jax.experimental import pallas as pl
from jax.experimental.pallas import tpu as pltpu


_LANE = 128
_TARGET_BLOCK_BYTES = 2 * 1024 * 1024     # ~2 MiB blocks: near HBM roofline, fits all gens
_MIN_PALLAS_BYTES = 256 * 1024            # below this, let XLA fuse a plain multiply


def _cdiv(a, b):
    return -(-a // b)


def _sublane_quantum(dtype):
    # rows per packed (sublane x lane) tile: 8 for 32-bit, 16 for bf16, 32 for int8/fp8
    return max(8, 32 // jnp.dtype(dtype).itemsize)


def _vmem_limit(block_bytes):
    # double-buffered input + output blocks (+ scale + slack); keep it well
    # under v7x's 64 MiB physical / 32 MiB default-scoped VMEM (16 MiB on v5e).
    return int(min(24 * 1024 * 1024, max(4 * 1024 * 1024, 5 * block_bytes)))


# ---------------------------------------------------------------------------
# Kernels
# ---------------------------------------------------------------------------

def _drop_path_batch_kernel(scale_ref, x_ref, o_ref):
    """Batch-major layout: x_ref/o_ref = (bn, td) lane-dense tile,
    scale_ref = (bn, 1) per-sample multiplier (f32, VMEM resident per tile)."""
    o_ref[...] = (x_ref[...].astype(jnp.float32) * scale_ref[...]).astype(o_ref.dtype)


def _drop_path_sample_kernel(scale_ref, x_ref, o_ref):
    """Sample-major layout: x_ref/o_ref = (1, br, 128) tile of one sample,
    scale_ref = full (N,) f32 scale vector resident in SMEM."""
    s = scale_ref[pl.program_id(0)]
    o_ref[...] = (x_ref[...].astype(jnp.float32) * s).astype(o_ref.dtype)


# ---------------------------------------------------------------------------
# Wrapper
# ---------------------------------------------------------------------------

def _drop_path_pallas(x, scale_f32, *, donate=False):
    """Computes x * scale_f32[:, None, ...] (f32 multiply, cast back to x.dtype)."""
    N = x.shape[0]
    D = math.prod(x.shape[1:])
    dtype = x.dtype
    itemsize = jnp.dtype(dtype).itemsize
    sub_q = _sublane_quantum(dtype)

    cost = pl.CostEstimate(
        flops=N * D,
        transcendentals=0,
        bytes_accessed=2 * N * D * itemsize + N * 4)
    io_alias = {1: 0} if donate else {}

    if N < sub_q and D % _LANE == 0:
        # --- sample-major: small batch would waste 75%+ of each vreg on the
        # sublane axis, so grid over (sample, row-tile) instead. -------------
        R = D // _LANE
        x3 = x.reshape(N, R, _LANE)

        budget_rows = max(sub_q, _TARGET_BLOCK_BYTES // (_LANE * itemsize))
        br = R if N > 1 else _cdiv(R, 2)          # N==1: split rows for the 2nd TC (v7x)
        br = min(br, budget_rows)
        if br >= R:
            br = R                                 # full (possibly ragged) row dim
        else:
            br = max(sub_q, (br // sub_q) * sub_q)
        grid = (N, _cdiv(R, br))
        block_bytes = br * _LANE * itemsize

        out = pl.pallas_call(
            _drop_path_sample_kernel,
            out_shape=jax.ShapeDtypeStruct((N, R, _LANE), dtype),
            grid_spec=pltpu.PrefetchScalarGridSpec(
                num_scalar_prefetch=0,
                grid=grid,
                in_specs=[
                    pl.BlockSpec(memory_space=pltpu.MemorySpace.SMEM),   # (N,) scale
                    pl.BlockSpec((1, br, _LANE), lambda i, j: (i, j, 0)),
                ],
                out_specs=pl.BlockSpec((1, br, _LANE), lambda i, j: (i, j, 0)),
            ),
            compiler_params=pltpu.CompilerParams(
                dimension_semantics=("parallel", "parallel"),
                vmem_limit_bytes=_vmem_limit(block_bytes)),
            cost_estimate=cost,
            input_output_aliases=io_alias,
        )(scale_f32.reshape(N), x3)
        return out.reshape(x.shape)

    # --- batch-major: N on sublanes, lane-dense column tiles, masked last tile
    x2 = x.reshape(N, D)
    scale2 = scale_f32.reshape(N, 1)

    bn = N
    if N * _LANE * itemsize > _TARGET_BLOCK_BYTES:
        bn = max(sub_q, (_TARGET_BLOCK_BYTES // (_LANE * itemsize)) // sub_q * sub_q)
    grid_n = _cdiv(N, bn)

    if D <= _LANE:
        td = D
    else:
        budget = max(_LANE, _TARGET_BLOCK_BYTES // (bn * itemsize))
        want = min(D, budget)
        if grid_n == 1:
            # ensure >= 2 grid steps so both v7x TensorCores get work
            want = min(want, max(_LANE, _cdiv(D, 2)))
        td = max(_LANE, (want // _LANE) * _LANE)
    grid = (grid_n, _cdiv(D, td))
    block_bytes = bn * td * itemsize

    out = pl.pallas_call(
        _drop_path_batch_kernel,
        out_shape=jax.ShapeDtypeStruct((N, D), dtype),
        grid_spec=pltpu.PrefetchScalarGridSpec(
            num_scalar_prefetch=0,
            grid=grid,
            in_specs=[
                pl.BlockSpec((bn, 1), lambda i, j: (i, 0)),    # per-sample scale
                pl.BlockSpec((bn, td), lambda i, j: (i, j)),   # lane-dense input tile
            ],
            out_specs=pl.BlockSpec((bn, td), lambda i, j: (i, j)),
        ),
        compiler_params=pltpu.CompilerParams(
            dimension_semantics=("parallel", "parallel"),
            vmem_limit_bytes=_vmem_limit(block_bytes)),
        cost_estimate=cost,
        input_output_aliases=io_alias,
    )(scale2, x2)
    return out.reshape(x.shape)


def drop_path_forward(x, drop_prob=0.0, training=False, scale_by_keep=True, *,
                      key=None, donate=False, min_pallas_bytes=_MIN_PALLAS_BYTES):
    """Functional equivalent of DropPath.forward / drop_path().

    `key` supplies the randomness for the per-sample Bernoulli mask (the JAX
    analogue of torch's in-place bernoulli_).  Set donate=True when the caller
    no longer needs x (aliases the input HBM buffer to the output).
    """
    if drop_prob == 0.0 or not training:
        return x                                    # identity path, no kernel needed
    keep_prob = 1.0 - drop_prob
    keep = jax.random.bernoulli(key, keep_prob, (x.shape[0],)).astype(jnp.float32)
    scale = keep / keep_prob if (keep_prob > 0.0 and scale_by_keep) else keep
    if x.size * jnp.dtype(x.dtype).itemsize < min_pallas_bytes:
        # Tiny tensors: a standalone pallas_call forces an un-fused HBM round
        # trip + launch overhead; let XLA fuse the broadcast-multiply instead.
        shape = (x.shape[0],) + (1,) * (x.ndim - 1)
        return (x.astype(jnp.float32) * scale.reshape(shape)).astype(x.dtype)
    return _drop_path_pallas(x, scale, donate=donate)


class DropPath:
    """Minimal stateful mirror of the torch module."""

    def __init__(self, drop_prob=0.0, scale_by_keep=True):
        self.drop_prob = drop_prob
        self.scale_by_keep = scale_by_keep
        self.training = True

    def __call__(self, x, *, key=None, donate=False):
        return drop_path_forward(x, self.drop_prob, self.training,
                                 self.scale_by_keep, key=key, donate=donate)


def _ref_drop_path(x, mask_key, keep_prob):
    """Pure-JAX reference (same f32-multiply-then-cast numerics)."""
    keep = jax.random.bernoulli(mask_key, keep_prob, (x.shape[0],)).astype(jnp.float32)
    scale = keep / keep_prob
    shape = (x.shape[0],) + (1,) * (x.ndim - 1)
    return (x.astype(jnp.float32) * scale.reshape(shape)).astype(x.dtype)


if __name__ == "__main__":
    key = jax.random.PRNGKey(0)
    k_x, k_mask, k_x2, k_x3 = jax.random.split(key, 4)

    drop_prob = 0.25
    keep_prob = 1.0 - drop_prob

    # 1) small-N f32 (N=2 < sublane quantum) -> sample-major kernel, scale from SMEM
    x = jax.random.normal(k_x, (2, 4, 16, 16), jnp.float32)
    out = drop_path_forward(x, drop_prob, training=True, key=k_mask,
                            min_pallas_bytes=0)
    out = jax.block_until_ready(out)
    assert out.shape == x.shape
    assert jnp.allclose(out, _ref_drop_path(x, k_mask, keep_prob), atol=1e-6, rtol=1e-6)

    # 2) N fills the sublane quantum, D not a multiple of 128 -> batch-major
    #    kernel with a masked ragged last lane tile; also exercise donation.
    x2 = jax.random.normal(k_x2, (8, 3, 33, 33), jnp.float32)
    ref2 = _ref_drop_path(x2, k_mask, keep_prob)            # compute ref before donating
    out2 = drop_path_forward(x2, drop_prob, training=True, key=k_mask,
                             donate=True, min_pallas_bytes=0)
    out2 = jax.block_until_ready(out2)
    assert jnp.allclose(out2, ref2, atol=1e-6, rtol=1e-6)

    # 3) bf16, small N -> sample-major kernel, f32 multiply then cast
    x3 = jax.random.normal(k_x3, (4, 8, 16, 16), jnp.bfloat16)
    out3 = drop_path_forward(x3, drop_prob, training=True, key=k_mask,
                             min_pallas_bytes=0)
    out3 = jax.block_until_ready(out3)
    assert jnp.allclose(out3.astype(jnp.float32),
                        _ref_drop_path(x3, k_mask, keep_prob).astype(jnp.float32),
                        atol=1e-2, rtol=1e-2)

    # 4) identity paths (eval mode, and drop_prob == 0 in training)
    out_eval = jax.block_until_ready(drop_path_forward(x, drop_prob, training=False))
    assert jnp.allclose(out_eval, x)
    out_p0 = jax.block_until_ready(drop_path_forward(x, 0.0, training=True, key=k_mask))
    assert jnp.allclose(out_p0, x)

    print("KERNEL_OK")
</pallas_src>

<mosaic_0001>
module attributes {stable_mosaic.version = 11 : i64} {
  func.func @_drop_path_sample_kernel(%arg0: i32, %arg1: i32, %arg2: memref<2xf32, #tpu.memory_space<smem>>, %arg3: memref<1x8x128xf32, #tpu.memory_space<vmem>>, %arg4: memref<1x8x128xf32, #tpu.memory_space<vmem>>) attributes {dimension_semantics = [#tpu.dimension_semantics<parallel>, #tpu.dimension_semantics<parallel>], iteration_bounds = array<i64: 2, 1>, scalar_prefetch = 0 : i64, scratch_operands = 0 : i64, tpu.core_type = #tpu.core_type<tc>, window_params = [{transform_indices = @transform_0, window_bounds = array<i64: 2>}, {transform_indices = @transform_1, window_bounds = array<i64: 1, 8, 128>}, {transform_indices = @transform_2, window_bounds = array<i64: 1, 8, 128>}]} {
    %0 = arith.index_cast %arg0 : i32 to index
    %1 = memref.load %arg2[%0] : memref<2xf32, #tpu.memory_space<smem>>
    %c0 = arith.constant 0 : index
    %c0_0 = arith.constant 0 : index
    %c0_1 = arith.constant 0 : index
    %2 = vector.load %arg3[%c0, %c0_0, %c0_1] : memref<1x8x128xf32, #tpu.memory_space<vmem>>, vector<1x8x128xf32>
    %3 = vector.broadcast %1 : f32 to vector<1x8x128xf32>
    %4 = arith.mulf %2, %3 : vector<1x8x128xf32>
    %c0_2 = arith.constant 0 : index
    %c0_3 = arith.constant 0 : index
    %c0_4 = arith.constant 0 : index
    %5 = vector.load %arg4[%c0_2, %c0_3, %c0_4] : memref<1x8x128xf32, #tpu.memory_space<vmem>>, vector<1x8x128xf32>
    tpu.vector_store %arg4[%c0_2, %c0_3, %c0_4], %4 {strides = array<i32>} : memref<1x8x128xf32, #tpu.memory_space<vmem>>, vector<1x8x128xf32>,
    return
  }
  func.func @transform_0(%arg0: i32, %arg1: i32) -> i32 {
    %c0_i32 = arith.constant 0 : i32
    %c0_i32_0 = arith.constant 0 : i32
    return %c0_i32 : i32
  }
  func.func @transform_1(%arg0: i32, %arg1: i32) -> (i32, i32, i32) {
    %c0_i32 = arith.constant 0 : i32
    %c0_i32_0 = arith.constant 0 : i32
    return %arg0, %arg1, %c0_i32 : i32, i32, i32
  }
  func.func @transform_2(%arg0: i32, %arg1: i32) -> (i32, i32, i32) {
    %c0_i32 = arith.constant 0 : i32
    %c0_i32_0 = arith.constant 0 : i32
    return %arg0, %arg1, %c0_i32 : i32, i32, i32
  }
}

</mosaic_0001>

<bundles_post_ra>
// kernel: tpu_custom_call.1
= control target key start
LH: loop header
LB: loop body
LE: loop exit
PB: predicated region body
PF: predicated region fallthrough
CT: control target
= control target key end

     0   :  { %7 = vsyncpa [#allocation5], 0  ;;  %s764_s0 = inlined_call_operand.hbm [shape: f32[2], index: 0, kind: input, shape index: {}]   ;;  %s765_s1 = inlined_call_operand.hbm [shape: f32[2,8,128], index: 1, kind: input, shape index: {}]   ;;  %s766_s2 = inlined_call_operand.hbm [shape: f32[2,8,128], index: 2, kind: output, shape index: {}]  }
   0x1   :  { %8 = vsyncpa [#allocation3], 0 }
   0x2   :  { %10 = vsyncpa [#allocation3 + $0x1], 0 }
   0x3   :  { %11 = vsyncpa [#allocation4], 0 }
   0x4   :  { %13 = vsyncpa [#allocation4 + $0x1], 0  ;;  %s537_s9 = smov 0   ;;  %s539_s10 = smov 0  }
   0x5   :  { %s541_s11 = smov 0   ;;  %s543_s12 = smov 0  }
   0x6   :  { %s545_s13 = smov 0   ;;  %s547_s14 = smov 0  }
   0x7 LB: > { %s300_s15 = sadd.s32 4294967295, %s517_s14   ;;  %s301_s16 = sadd.s32 4294967294, %s517_s14   ;;  %s517_s14 = sphi %s547_s14, %s19_s14   ;;  %s513_s13 = sphi %s545_s13, %s790_s13   ;;  %s509_s12 = sphi %s543_s12, %s789_s12   ;;  %s505_s11 = sphi %s541_s11, %s788_s11   ;;  %s501_s10 = sphi %s539_s10, %s787_s10   ;;  %s497_s9 = sphi %s537_s9, %s786_s9  }
   0x8   : > { %p74_p0 = scmp.ne.s32.totalorder %s501_s10, %s497_s9  ;;  %p571_p1 = scmp.eq.s32.totalorder %s300_s15, 0 }
   0x9   : > { %p575_p2 = scmp.eq.s32.totalorder %s300_s15, 1  ;;  %p106_p3 = scmp.eq.s32.totalorder %s301_s16, 1 }
   0xa   : > { %s771_s17 = scalar_select %p571_p1, 1, 0 }
   0xb   : > { %p581_p4 = por %p571_p1, %p74_p0  ;;  %p302_p5 = scmp.ge.s32.totalorder %s517_s14, 1 }
   0xc   : > { %p586_p6 = por %p106_p3, %p74_p0  ;;  %p113_p7 = scmp.lt.s32.totalorder %s517_s14, 3 }
   0xd   : > { %s773_s19 = scalar_select %p581_p4, 1, 0 }
   0xe   : > { %s774_s20 = scalar_select %p586_p6, 1, 0 }
   0xf   : > { %p591_p8 = pnand %p302_p5, %p113_p7  ;;  %s31_s22 = sadd.s32 1, %s513_s13 }
  0x10   : > { %p605_p12 = scmp.ge.s32.totalorder %s31_s22, 2  ;;  %s61_s25 = sadd.s32 1, %s505_s11 }
  0x11   : > { %p323_p10 = pneg %p591_p8  ;;  %p68_p13 = scmp.ne.s32.totalorder %s505_s11, %s501_s10 }
  0x12   : > { %p69_p0 = scmp.eq.s32.totalorder %s517_s14, 0  ;;  %s388_s28 = scalar_lea.hbm %s764_s0, 16 }
  0x13   : > { %p601_p11 = pnand %p323_p10, %p571_p1  ;;  %p389_p3 = scmp.ne.s32.totalorder %s764_s0, %s388_s28 }
  0x14   : > { %p395_p9 = scmp.lt.u32.totalorder %s388_s28, %s764_s0 }
  0x15   : > { %p390_p5 = pneg %p601_p11 }
  0x17   : > { %p391_p7 = pnand %p390_p5, %p389_p3 }
  0x19   : > { %p392_p10 = pneg %p391_p7 }
  0x1b   : > { %p397_p6 = pnand %p395_p9, %p392_p10 }
  0x1d   : > { %400 = shalt.err (!%p397_p6)
}
  0x1e   : > { %s519_s5 = smov [#allocation2]   ;;  %s792_s22 = smov (%p605_p12, %s31_s22), 0 }
  0x1f   : > { %326 = dma.hbm_to_smem (!%p601_p11), %s764_s0, 16, %s519_s5, [#allocation5]  }
  0x20   : > { %p636_p6 = por %p69_p0, %p68_p13  ;;  %p645_p9 = por %p575_p2, %p68_p13 }
  0x21   : > { %s56_s16 = ssub.s32 %s513_s13, %s792_s22  ;;  %p336_p3 = scmp.lt.s32.totalorder %s517_s14, 2 }
  0x22   : > { %s779_s15 = scalar_select %p645_p9, 1, 0 }
  0x23   : > { %p59_p5 = scmp.eq.s32.totalorder %s56_s16, 0  ;;  %s135_s23 = sand.u32 1, %s505_s11  }
  0x24   : > { %s305_s24 = sshll.u32 %s135_s23, 3  ;;  %s306_s27 = sshll.u32 %s513_s13, 7 }
  0x25   : > { %s654_s26 = scalar_select %p59_p5, %s505_s11, %s61_s25  }
  0x26   : > { %s660_s30 = scalar_lea.hbm %s765_s1, %s306_s27  ;;  %s139_s18 = scalar_lea.vmem [#allocation6], %s305_s24 }
  0x27   : > { %s147_s3 = sshll.u32 %s139_s18, 4  ;;  %p666_p2 = pnand %p336_p3, %p636_p6  ;;  %s662_s3 = int_to_ptr.vmem [resolvable:$true] %s147_s3 }
  0x28   : > { %s136_s25 = scalar_lea.sflag [#allocation3], %s135_s23  ;;  %s401_s5 = scalar_lea.hbm %s660_s30, 128 }
  0x29   : > { %p402_p11 = scmp.ne.s32.totalorder %s660_s30, %s401_s5  ;;  %p403_p12 = pneg %p666_p2 }
  0x2a   : > { %s406_s16 = scalar_lea.hbm %s765_s1, 256  ;;  %p407_p7 = scmp.lt.u32.totalorder %s660_s30, %s765_s1 }
  0x2b   : > { %p404_p13 = pnand %p403_p12, %p402_p11  ;;  %p408_p10 = scmp.lt.u32.totalorder %s406_s16, %s401_s5 }
  0x2c   : > { %p410_p3 = scmp.lt.u32.totalorder %s401_s5, %s660_s30 }
  0x2d   : > { %p405_p0 = pneg %p404_p13  ;;  %p409_p6 = por %p408_p10, %p407_p7 }
  0x2f   : > { %p411_p5 = por %p410_p3, %p409_p6 }
  0x31   : > { %p412_p9 = pnand %p411_p5, %p405_p0 }
  0x33   : > { %415 = shalt.err (!%p412_p9)
}
  0x34   : > { %s416_s23 = scalar_lea.vmem %s662_s3, 128  ;;  %s520_s27 = smov [#allocation6]  }
  0x35   : > { %p417_p11 = scmp.ne.s32.totalorder %s662_s3, %s416_s23  ;;  %s421_s28 = sshll.u32 %s520_s27, 4  ;;  %s422_s28 = int_to_ptr.vmem [resolvable:$false] %s421_s28 }
  0x36   : > { %s423_s29 = scalar_lea.vmem %s422_s28, 256  ;;  %p424_p1 = scmp.lt.s32.totalorder %s662_s3, %s422_s28 }
  0x37   : > { %p419_p13 = pnand %p417_p11, %p403_p12  ;;  %p425_p7 = scmp.lt.s32.totalorder %s423_s29, %s416_s23 }
  0x39   : > { %p420_p4 = pneg %p419_p13  ;;  %p426_p10 = por %p425_p7, %p424_p1 }
  0x3b   : > { %p427_p6 = pnand %p426_p10, %p420_p4 }
  0x3d   : > { %430 = shalt.err (!%p427_p6)
}
  0x3e   : > { %330 = dma.hbm_to_vmem [thread:$0]  (!%p666_p2), %s660_s30, 128, %s662_s3, %s136_s25  }
  0x3f   : > { %156 = sbr.rel (%p591_p8) target bundleno = 103 (0x67), region = 28  ;;  %p781_p9 = scmp.ne.s32.totalorder (!%p591_p8), %s771_s17, 0 }
  0x46   : > { %484 = dma.done.wait (%p781_p9), [#allocation5], 16  }
  0x47   : > { %486 = vsyncadd (%p781_p9), [#allocation5], 4294967280  ;;  %s702_s18 = sand.u32 1, %s501_s10   ;;  %p782_p1 = scmp.ne.s32.totalorder %s773_s19, 0 }
  0x48   : > { %s309_s5 = sshll.u32 %s702_s18, 3  ;;  %s163_s4 = scalar_lea.sflag [#allocation3], %s702_s18 }
  0x49   : > { %s166_s6 = scalar_lea.vmem [#allocation6], %s309_s5 }
  0x4a   : > { %488 = dma.done.wait (%p782_p1), %s163_s4, 128  }
  0x4b   : > { %490 = vsyncadd (%p782_p1), %s163_s4, 4294967168 }
  0x4c   : > { %171 = sfence }
  0x4d   : > { %s188_s17 = sld [smem:[#allocation2 + %s509_s12]]  ;;  %v189_v0 = vld [vmem:[%s166_s6] sm:$0xff]  ;;  %s187_s21 = scalar_lea.vmem [#allocation7], %s309_s5 }
  0x4e   : > { %s208_s30 = sshll.u32 %s187_s21, 4  ;;  %s312_s3 = sshll.u32 %s509_s12, 7  ;;  %s712_s30 = int_to_ptr.vmem [resolvable:$true] %s208_s30 }
  0x4f   : > { %s717_s19 = scalar_lea.hbm %s766_s2, %s312_s3  ;;  %s194_s16 = scalar_lea.sflag [#allocation4], %s702_s18 }
  0x50   : > { %s431_s8 = scalar_lea.vmem %s712_s30, 128  ;;  %p783_p8 = scmp.ne.s32.totalorder %s779_s15, 0 }
  0x51   : > { %p432_p4 = scmp.ne.s32.totalorder %s712_s30, %s431_s8  ;;  %s521_s12 = smov [#allocation7]  }
  0x52   : > { %s435_s24 = sshll.u32 %s521_s12, 4  ;;  %s436_s24 = int_to_ptr.vmem [resolvable:$false] %s435_s24 }
  0x53   : > { %v190_v1 = vstv %s188_s17  ;;  %p433_p2 = pnand %p432_p4, %p783_p8  ;;  %s437_s23 = scalar_lea.vmem %s436_s24, 256 }
  0x54   : > { %v191_v2 = vmul.f32 %v190_v1, %v189_v0  ;;  %p438_p0 = scmp.lt.s32.totalorder %s712_s30, %s436_s24  ;;  %p439_p3 = scmp.lt.s32.totalorder %s437_s23, %s431_s8 }
  0x55   : > { %p434_p12 = pneg %p433_p2 }
  0x56   : > { %192 = vst [vmem:[%s187_s21] sm:$0xff] %v191_v2  ;;  %p440_p5 = por %p439_p3, %p438_p0 }
  0x58   : > { %p441_p11 = pnand %p440_p5, %p434_p12 }
  0x5a   : > { %444 = shalt.err (!%p441_p11)
}
  0x5b   : > { %s445_s27 = scalar_lea.hbm %s717_s19, 128  ;;  %s449_s18 = scalar_lea.hbm %s766_s2, 256 }
  0x5c   : > { %p446_p13 = scmp.ne.s32.totalorder %s717_s19, %s445_s27  ;;  %p450_p6 = scmp.lt.u32.totalorder %s717_s19, %s766_s2 }
  0x5d   : > { %p451_p9 = scmp.lt.u32.totalorder %s449_s18, %s445_s27  ;;  %p453_p4 = scmp.lt.u32.totalorder %s445_s27, %s717_s19 }
  0x5e   : > { %p447_p7 = pnand %p446_p13, %p783_p8 }
  0x5f   : > { %p452_p1 = por %p451_p9, %p450_p6 }
  0x60   : > { %p448_p10 = pneg %p447_p7 }
  0x61   : > { %p454_p2 = por %p453_p4, %p452_p1 }
  0x63   : > { %p455_p12 = pnand %p454_p2, %p448_p10 }
  0x65   : > { %458 = shalt.err (!%p455_p12)
}
  0x66   : > { %321 = dma.vmem_to_hbm [thread:$0]  (%p783_p8), %s712_s30, 128, %s717_s19, %s194_s16  }
  0x67 PF: > { %s220_s6 = sand.u32 1, %s497_s9   ;;  %p784_p0 = scmp.ne.s32.totalorder %s774_s20, 0 }
  0x68   : > { %p785_p3 = scmp.ge.s32.totalorder %s517_s14, 2  ;;  %s221_s17 = scalar_lea.sflag [#allocation4], %s220_s6 }
  0x6a   : > { %p332_p5 = pnand %p785_p3, %p784_p0 }
  0x6c   : > { %492 = dma.done.wait (!%p332_p5), %s221_s17, 128  }
  0x6d   : > { %494 = vsyncadd (!%p332_p5), %s221_s17, 4294967168  ;;  %s19_s14 = sadd.s32 1, %s517_s14   ;;  %s786_s9 = smov %s501_s10 }
  0x6e   : > { %p16_p11 = scmp.ge.s32.totalorder %s19_s14, 4   ;;  %s787_s10 = smov %s505_s11 }
  0x6f   : > { %s788_s11 = smov %s654_s26  ;;  %s789_s12 = smov %s513_s13 }
  0x70   : > { %s790_s13 = smov %s792_s22  ;;  %18 = sbr.rel (!%p16_p11) target bundleno = 7 (0x7), region = 78 }
  0x77   :  { %226 = vsyncpa [#allocation3], 1 }
  0x78   :  { %228 = vsyncpa [#allocation3 + $0x1], 1 }
  0x79   :  { %229 = vsyncpa [#allocation4], 1 }
  0x7a   :  { %231 = vsyncpa [#allocation4 + $0x1], 1 }
  0x7b   :  { %232 = vsyncpa [#allocation5], 1 }
  0x7c   :  { %234 = vsyncpa [#allocation5 + $0x1], 1 }

</bundles_post_ra>
